<compile_context>
chip_gen: v7x
topology: tpu7x:2x2x1
jax: 0.10.0
libtpu: 0.0.40
codegen_flags: <defaults>
</compile_context>

<pallas_src>
import math

import jax
import jax.numpy as jnp
from jax.experimental import pallas as pl
from jax.experimental.pallas import tpu as pltpu


def _lstm_linear_kernel(x_ref, w_ref, y_ref):
    # x_ref: (T, bt)  time-major input tile (input_size == 1 squeezed).
    # w_ref: (8, 8)   packed parameters, gate rows reordered to (i, f, o, g),
    #                 i/f/o rows of cols 0..3 pre-scaled by 0.5:
    #                   col 0: W_ih (4H x 1)
    #                   col 1: W_hh[:, 0]
    #                   col 2: W_hh[:, 1]
    #                   col 3: b_ih + b_hh
    #                   col 4: [w_lin[0,0], w_lin[0,1], b_lin[0], 0, ...]
    # y_ref: (T, bt)  per-step linear output.
    T, bt = x_ref.shape
    G, _ = w_ref.shape
    H = G // 4

    w = w_ref[...]                          # one tiny load of all parameters
    wl0 = w[0:1, 4:5]                       # (1, 1) linear head coefficients
    wl1 = w[1:2, 4:5]
    bl = w[2:3, 4:5]

    STRIP = 128                             # one vreg of lanes per strip
    if bt % STRIP == 0:
        widths = [STRIP] * (bt // STRIP)
    else:                                   # tiny full-array block (bt == B < 128)
        widths = [bt]

    # Hoisted lane-broadcasts of the per-gate-row coefficients.  All strips
    # share them; JAX does not CSE broadcast_in_dim, so build them exactly
    # once per kernel invocation (4 vregs live across the strip loop).
    sw = widths[0]
    wih_b = jnp.broadcast_to(w[:, 0:1], (G, sw))
    whh0_b = jnp.broadcast_to(w[:, 1:2], (G, sw))
    whh1_b = jnp.broadcast_to(w[:, 2:3], (G, sw))
    b_b = jnp.broadcast_to(w[:, 3:4], (G, sw))

    col = 0
    for width in widths:                    # static strip loop, static slices
        x_s = x_ref[:, col:col + width]     # (T, width): one dense load
        h0 = jnp.zeros((1, width), jnp.float32)
        h1 = jnp.zeros((1, width), jnp.float32)
        c = jnp.zeros((H, width), jnp.float32)
        for t in range(T):                  # T is small & static -> full unroll
            # gates rows = [i; f; o; g]; i/f/o rows hold 0.5*z (pre-scaled).
            gates = (wih_b * x_s[t:t + 1, :] + b_b
                     + whh0_b * h0 + whh1_b * h1)          # (G, width), VPU only
            act = jnp.tanh(gates)                          # ONE EUP push / vreg
            sig = act[0:3 * H, :] * 0.5 + 0.5              # sigmoid(z)=.5*tanh(z/2)+.5
            i_g = sig[0:H, :]
            f_g = sig[H:2 * H, :]
            o_g = sig[2 * H:3 * H, :]
            g_g = act[3 * H:4 * H, :]                      # tanh rows (unscaled)
            c = f_g * c + i_g * g_g                        # (H, width)
            h = o_g * jnp.tanh(c)                          # (H, width)
            h0 = h[0:1, :]
            h1 = h[1:2, :]
            # Linear head fused into the step; lane-dense (1, width) VMEM store
            # straight into the output block (no h-row lists kept live).
            y_ref[t:t + 1, col:col + width] = wl0 * h0 + wl1 * h1 + bl
        col += width


def _pack_params(params):
    """Pack all LSTM + Linear parameters into one padded (8, 8) f32 tile."""
    w_ih, w_hh, b_ih, b_hh, w_lin, b_lin = params
    G, H = w_hh.shape                       # G = 4H
    # PyTorch gate order along 4H is (i, f, g, o); reorder to (i, f, o, g) so
    # the sigmoid gates are the contiguous rows [0, 3H) and tanh rows [3H, 4H).
    perm = jnp.asarray(list(range(0, 2 * H)) + list(range(3 * H, 4 * H))
                       + list(range(2 * H, 3 * H)), jnp.int32)
    # Fold sigmoid(z) = 0.5*tanh(0.5*z) + 0.5 into the weights: pre-scale the
    # i/f/o rows by 0.5 so the kernel needs a single tanh over the gate tile.
    row_scale = jnp.concatenate([jnp.full((3 * H, 1), 0.5, jnp.float32),
                                 jnp.ones((H, 1), jnp.float32)], axis=0)
    wih_r = w_ih.astype(jnp.float32)[perm] * row_scale                 # (G, 1)
    whh_r = w_hh.astype(jnp.float32)[perm] * row_scale                 # (G, H)
    b_r = (b_ih + b_hh).astype(jnp.float32)[perm][:, None] * row_scale  # (G, 1)
    head = jnp.zeros((G, 1), jnp.float32)
    head = head.at[0, 0].set(w_lin[0, 0].astype(jnp.float32))
    head = head.at[1, 0].set(w_lin[0, 1].astype(jnp.float32))
    head = head.at[2, 0].set(b_lin[0].astype(jnp.float32))
    pad = jnp.zeros((G, 8 - (1 + H + 1 + 1)), jnp.float32)
    return jnp.concatenate([wih_r, whh_r, b_r, head, pad], axis=1)     # (8, 8)


def recnn_forward(x, params, *, lane_tile=1024):
    """x: (B, T, 1) float32, like the PyTorch batch_first LSTM input.

    Returns (B*T, 1), matching RecNN.forward's output.reshape(-1, 2) @ linear.
    """
    B, T, _ = x.shape
    wmat = _pack_params(params)             # (8, 8) packed parameter tile
    G = wmat.shape[0]

    # Time-major layout for the kernel: time -> sublanes, batch -> lanes.
    x_tm = jnp.transpose(x[..., 0], (1, 0)).astype(jnp.float32)        # (T, B)

    # Lane (batch) tile selection:
    #  * B <= 128: single full-array block (degenerate small case).
    #  * otherwise: a multiple of 128, chosen so the grid has >= 2 steps (so
    #    the "parallel" axis can shard across v7x's two TensorCores for
    #    moderate B), capped at lane_tile, and bounded by a VMEM guard
    #    (in+out double-buffered ~ 16*T*bt bytes) for long sequences.
    if B <= 128:
        bt = B
    else:
        half_128 = ((pl.cdiv(B, 2) + 127) // 128) * 128
        bt = min(lane_tile, max(128, half_128))
        while bt > 128 and 16 * T * bt > 8 * 1024 * 1024:
            bt -= 128
    Bp = ((B + bt - 1) // bt) * bt
    if Bp != B:
        x_tm = jnp.pad(x_tm, ((0, 0), (0, Bp - B)))
    grid = (Bp // bt,)

    y_tm = pl.pallas_call(
        _lstm_linear_kernel,
        out_shape=jax.ShapeDtypeStruct((T, Bp), jnp.float32),
        grid=grid,
        in_specs=[
            pl.BlockSpec((T, bt), lambda i: (0, i)),    # x tile (lane-tiled)
            pl.BlockSpec((G, 8), lambda i: (0, 0)),     # packed params (one DMA)
        ],
        out_specs=pl.BlockSpec((T, bt), lambda i: (0, i)),
        compiler_params=pltpu.CompilerParams(
            dimension_semantics=("parallel",)),
    )(x_tm, wmat)

    y_tm = y_tm[:, :B]
    # torch: output (B, T, H) -> reshape(-1, H) -> linear -> (B*T, 1)
    return jnp.transpose(y_tm, (1, 0)).reshape(B * T, 1)


def recnn_ref(x, params):
    """Pure-JAX reference mirroring torch.nn.LSTM + Linear semantics."""
    w_ih, w_hh, b_ih, b_hh, w_lin, b_lin = params
    B, T, _ = x.shape
    H = w_hh.shape[1]
    h = jnp.zeros((B, H), jnp.float32)
    c = jnp.zeros((B, H), jnp.float32)
    outs = []
    for t in range(T):
        x_t = x[:, t, :]                                 # (B, 1)
        gates = x_t @ w_ih.T + h @ w_hh.T + b_ih + b_hh  # (B, 4H), order i,f,g,o
        i_g = jax.nn.sigmoid(gates[:, 0 * H:1 * H])
        f_g = jax.nn.sigmoid(gates[:, 1 * H:2 * H])
        g_g = jnp.tanh(gates[:, 2 * H:3 * H])
        o_g = jax.nn.sigmoid(gates[:, 3 * H:4 * H])
        c = f_g * c + i_g * g_g
        h = o_g * jnp.tanh(c)
        outs.append(h)
    out = jnp.stack(outs, axis=1)                        # (B, T, H)
    return out.reshape(-1, H) @ w_lin.T + b_lin          # (B*T, 1)


def init_params(key, input_size=1, hidden_size=2):
    """Deterministic params with PyTorch-style U(-1/sqrt(H), 1/sqrt(H)) init."""
    ks = jax.random.split(key, 6)
    stdv = 1.0 / math.sqrt(hidden_size)

    def u(k, shape):
        return jax.random.uniform(k, shape, jnp.float32, -stdv, stdv)

    w_ih = u(ks[0], (4 * hidden_size, input_size))   # weight_ih_l0
    w_hh = u(ks[1], (4 * hidden_size, hidden_size))  # weight_hh_l0
    b_ih = u(ks[2], (4 * hidden_size,))              # bias_ih_l0
    b_hh = u(ks[3], (4 * hidden_size,))              # bias_hh_l0
    w_lin = u(ks[4], (1, hidden_size))               # linear.weight
    b_lin = u(ks[5], (1,))                           # linear.bias
    return (w_ih, w_hh, b_ih, b_hh, w_lin, b_lin)


if __name__ == "__main__":
    key = jax.random.PRNGKey(0)
    k_param, k_x1, k_x2 = jax.random.split(key, 3)

    params = init_params(k_param)

    # Primary small shape implied by the module: batch=2, seq=8, input_size=1.
    B, T = 2, 8
    x = jax.random.normal(k_x1, (B, T, 1), jnp.float32)
    y = jax.block_until_ready(recnn_forward(x, params))
    y_ref = recnn_ref(x, params)
    assert y.shape == (B * T, 1), y.shape
    assert jnp.allclose(y, y_ref, rtol=1e-5, atol=1e-5), (
        "mismatch vs reference (small):\n%s\n%s" % (y, y_ref))

    # Secondary shape exercising lane padding, grid > 1 (dual-TC path on v7x)
    # and the in-kernel 128-lane strip loop.
    B2, T2 = 384, 8
    x2 = jax.random.normal(k_x2, (B2, T2, 1), jnp.float32)
    y2 = jax.block_until_ready(recnn_forward(x2, params))
    y2_ref = recnn_ref(x2, params)
    assert y2.shape == (B2 * T2, 1), y2.shape
    assert jnp.allclose(y2, y2_ref, rtol=1e-5, atol=1e-5), "mismatch (large)"

    print("KERNEL_OK")
</pallas_src>

<mosaic_0001>
module attributes {stable_mosaic.version = 11 : i64} {
  func.func @_lstm_linear_kernel(%arg0: i32, %arg1: memref<8x2xf32, #tpu.memory_space<vmem>>, %arg2: memref<8x8xf32, #tpu.memory_space<vmem>>, %arg3: memref<8x2xf32, #tpu.memory_space<vmem>>) attributes {dimension_semantics = [#tpu.dimension_semantics<parallel>], iteration_bounds = array<i64: 1>, scalar_prefetch = 0 : i64, scratch_operands = 0 : i64, tpu.core_type = #tpu.core_type<tc>, window_params = [{transform_indices = @transform_0, window_bounds = array<i64: 8, 2>}, {pipeline_mode = #tpu.pipeline_mode<synchronous>, transform_indices = @transform_1, window_bounds = array<i64: 8, 8>}, {transform_indices = @transform_2, window_bounds = array<i64: 8, 2>}]} {
    %c0 = arith.constant 0 : index
    %c0_0 = arith.constant 0 : index
    %0 = vector.load %arg2[%c0, %c0_0] : memref<8x8xf32, #tpu.memory_space<vmem>>, vector<8x8xf32>
    %1 = vector.extract_strided_slice %0 {offsets = [0, 4], sizes = [1, 1], strides = [1, 1]} : vector<8x8xf32> to vector<1x1xf32>
    %2 = vector.extract_strided_slice %0 {offsets = [1, 4], sizes = [1, 1], strides = [1, 1]} : vector<8x8xf32> to vector<1x1xf32>
    %3 = vector.extract_strided_slice %0 {offsets = [2, 4], sizes = [1, 1], strides = [1, 1]} : vector<8x8xf32> to vector<1x1xf32>
    %4 = vector.extract_strided_slice %0 {offsets = [0, 0], sizes = [8, 1], strides = [1, 1]} : vector<8x8xf32> to vector<8x1xf32>
    %5 = vector.shape_cast %4 : vector<8x1xf32> to vector<8x1xf32>
    %6 = vector.broadcast %5 : vector<8x1xf32> to vector<8x2xf32>
    %7 = vector.extract_strided_slice %0 {offsets = [0, 1], sizes = [8, 1], strides = [1, 1]} : vector<8x8xf32> to vector<8x1xf32>
    %8 = vector.shape_cast %7 : vector<8x1xf32> to vector<8x1xf32>
    %9 = vector.broadcast %8 : vector<8x1xf32> to vector<8x2xf32>
    %10 = vector.extract_strided_slice %0 {offsets = [0, 2], sizes = [8, 1], strides = [1, 1]} : vector<8x8xf32> to vector<8x1xf32>
    %11 = vector.shape_cast %10 : vector<8x1xf32> to vector<8x1xf32>
    %12 = vector.broadcast %11 : vector<8x1xf32> to vector<8x2xf32>
    %13 = vector.extract_strided_slice %0 {offsets = [0, 3], sizes = [8, 1], strides = [1, 1]} : vector<8x8xf32> to vector<8x1xf32>
    %14 = vector.shape_cast %13 : vector<8x1xf32> to vector<8x1xf32>
    %15 = vector.broadcast %14 : vector<8x1xf32> to vector<8x2xf32>
    %c0_1 = arith.constant 0 : index
    %c0_2 = arith.constant 0 : index
    %16 = vector.load %arg1[%c0_1, %c0_2] : memref<8x2xf32, #tpu.memory_space<vmem>>, vector<8x2xf32>
    %cst = arith.constant 0.000000e+00 : f32
    %17 = vector.broadcast %cst : f32 to vector<1x2xf32>
    %cst_3 = arith.constant 0.000000e+00 : f32
    %18 = vector.broadcast %cst_3 : f32 to vector<1x2xf32>
    %cst_4 = arith.constant 0.000000e+00 : f32
    %19 = vector.broadcast %cst_4 : f32 to vector<2x2xf32>
    %20 = vector.extract_strided_slice %16 {offsets = [0, 0], sizes = [1, 2], strides = [1, 1]} : vector<8x2xf32> to vector<1x2xf32>
    %21 = vector.broadcast %20 : vector<1x2xf32> to vector<8x2xf32>
    %22 = arith.mulf %6, %21 : vector<8x2xf32>
    %23 = arith.addf %22, %15 : vector<8x2xf32>
    %24 = vector.broadcast %17 : vector<1x2xf32> to vector<8x2xf32>
    %25 = arith.mulf %9, %24 : vector<8x2xf32>
    %26 = arith.addf %23, %25 : vector<8x2xf32>
    %27 = vector.broadcast %18 : vector<1x2xf32> to vector<8x2xf32>
    %28 = arith.mulf %12, %27 : vector<8x2xf32>
    %29 = arith.addf %26, %28 : vector<8x2xf32>
    %30 = math.tanh %29 : vector<8x2xf32>
    %31 = vector.extract_strided_slice %30 {offsets = [0, 0], sizes = [6, 2], strides = [1, 1]} : vector<8x2xf32> to vector<6x2xf32>
    %cst_5 = arith.constant 5.000000e-01 : f32
    %32 = vector.broadcast %cst_5 : f32 to vector<6x2xf32>
    %33 = arith.mulf %31, %32 : vector<6x2xf32>
    %cst_6 = arith.constant 5.000000e-01 : f32
    %34 = vector.broadcast %cst_6 : f32 to vector<6x2xf32>
    %35 = arith.addf %33, %34 : vector<6x2xf32>
    %36 = vector.extract_strided_slice %35 {offsets = [0, 0], sizes = [2, 2], strides = [1, 1]} : vector<6x2xf32> to vector<2x2xf32>
    %37 = vector.extract_strided_slice %35 {offsets = [2, 0], sizes = [2, 2], strides = [1, 1]} : vector<6x2xf32> to vector<2x2xf32>
    %38 = vector.extract_strided_slice %35 {offsets = [4, 0], sizes = [2, 2], strides = [1, 1]} : vector<6x2xf32> to vector<2x2xf32>
    %39 = vector.extract_strided_slice %30 {offsets = [6, 0], sizes = [2, 2], strides = [1, 1]} : vector<8x2xf32> to vector<2x2xf32>
    %40 = arith.mulf %37, %19 : vector<2x2xf32>
    %41 = arith.mulf %36, %39 : vector<2x2xf32>
    %42 = arith.addf %40, %41 : vector<2x2xf32>
    %43 = math.tanh %42 : vector<2x2xf32>
    %44 = arith.mulf %38, %43 : vector<2x2xf32>
    %45 = vector.extract_strided_slice %44 {offsets = [0, 0], sizes = [1, 2], strides = [1, 1]} : vector<2x2xf32> to vector<1x2xf32>
    %46 = vector.extract_strided_slice %44 {offsets = [1, 0], sizes = [1, 2], strides = [1, 1]} : vector<2x2xf32> to vector<1x2xf32>
    %47 = vector.broadcast %1 : vector<1x1xf32> to vector<1x2xf32>
    %48 = arith.mulf %47, %45 : vector<1x2xf32>
    %49 = vector.broadcast %2 : vector<1x1xf32> to vector<1x2xf32>
    %50 = arith.mulf %49, %46 : vector<1x2xf32>
    %51 = arith.addf %48, %50 : vector<1x2xf32>
    %52 = vector.broadcast %3 : vector<1x1xf32> to vector<1x2xf32>
    %53 = arith.addf %51, %52 : vector<1x2xf32>
    %c0_7 = arith.constant 0 : index
    %c0_8 = arith.constant 0 : index
    %54 = vector.load %arg3[%c0_7, %c0_8] : memref<8x2xf32, #tpu.memory_space<vmem>>, vector<1x2xf32>
    tpu.vector_store %arg3[%c0_7, %c0_8], %53 {strides = array<i32>} : memref<8x2xf32, #tpu.memory_space<vmem>>, vector<1x2xf32>,
    %55 = vector.extract_strided_slice %16 {offsets = [1, 0], sizes = [1, 2], strides = [1, 1]} : vector<8x2xf32> to vector<1x2xf32>
    %56 = vector.broadcast %55 : vector<1x2xf32> to vector<8x2xf32>
    %57 = arith.mulf %6, %56 : vector<8x2xf32>
    %58 = arith.addf %57, %15 : vector<8x2xf32>
    %59 = vector.broadcast %45 : vector<1x2xf32> to vector<8x2xf32>
    %60 = arith.mulf %9, %59 : vector<8x2xf32>
    %61 = arith.addf %58, %60 : vector<8x2xf32>
    %62 = vector.broadcast %46 : vector<1x2xf32> to vector<8x2xf32>
    %63 = arith.mulf %12, %62 : vector<8x2xf32>
    %64 = arith.addf %61, %63 : vector<8x2xf32>
    %65 = math.tanh %64 : vector<8x2xf32>
    %66 = vector.extract_strided_slice %65 {offsets = [0, 0], sizes = [6, 2], strides = [1, 1]} : vector<8x2xf32> to vector<6x2xf32>
    %cst_9 = arith.constant 5.000000e-01 : f32
    %67 = vector.broadcast %cst_9 : f32 to vector<6x2xf32>
    %68 = arith.mulf %66, %67 : vector<6x2xf32>
    %cst_10 = arith.constant 5.000000e-01 : f32
    %69 = vector.broadcast %cst_10 : f32 to vector<6x2xf32>
    %70 = arith.addf %68, %69 : vector<6x2xf32>
    %71 = vector.extract_strided_slice %70 {offsets = [0, 0], sizes = [2, 2], strides = [1, 1]} : vector<6x2xf32> to vector<2x2xf32>
    %72 = vector.extract_strided_slice %70 {offsets = [2, 0], sizes = [2, 2], strides = [1, 1]} : vector<6x2xf32> to vector<2x2xf32>
    %73 = vector.extract_strided_slice %70 {offsets = [4, 0], sizes = [2, 2], strides = [1, 1]} : vector<6x2xf32> to vector<2x2xf32>
    %74 = vector.extract_strided_slice %65 {offsets = [6, 0], sizes = [2, 2], strides = [1, 1]} : vector<8x2xf32> to vector<2x2xf32>
    %75 = arith.mulf %72, %42 : vector<2x2xf32>
    %76 = arith.mulf %71, %74 : vector<2x2xf32>
    %77 = arith.addf %75, %76 : vector<2x2xf32>
    %78 = math.tanh %77 : vector<2x2xf32>
    %79 = arith.mulf %73, %78 : vector<2x2xf32>
    %80 = vector.extract_strided_slice %79 {offsets = [0, 0], sizes = [1, 2], strides = [1, 1]} : vector<2x2xf32> to vector<1x2xf32>
    %81 = vector.extract_strided_slice %79 {offsets = [1, 0], sizes = [1, 2], strides = [1, 1]} : vector<2x2xf32> to vector<1x2xf32>
    %82 = vector.broadcast %1 : vector<1x1xf32> to vector<1x2xf32>
    %83 = arith.mulf %82, %80 : vector<1x2xf32>
    %84 = vector.broadcast %2 : vector<1x1xf32> to vector<1x2xf32>
    %85 = arith.mulf %84, %81 : vector<1x2xf32>
    %86 = arith.addf %83, %85 : vector<1x2xf32>
    %87 = vector.broadcast %3 : vector<1x1xf32> to vector<1x2xf32>
    %88 = arith.addf %86, %87 : vector<1x2xf32>
    %c1 = arith.constant 1 : index
    %c0_11 = arith.constant 0 : index
    %89 = vector.load %arg3[%c1, %c0_11] : memref<8x2xf32, #tpu.memory_space<vmem>>, vector<1x2xf32>
    tpu.vector_store %arg3[%c1, %c0_11], %88 {strides = array<i32>} : memref<8x2xf32, #tpu.memory_space<vmem>>, vector<1x2xf32>,
    %90 = vector.extract_strided_slice %16 {offsets = [2, 0], sizes = [1, 2], strides = [1, 1]} : vector<8x2xf32> to vector<1x2xf32>
    %91 = vector.broadcast %90 : vector<1x2xf32> to vector<8x2xf32>
    %92 = arith.mulf %6, %91 : vector<8x2xf32>
    %93 = arith.addf %92, %15 : vector<8x2xf32>
    %94 = vector.broadcast %80 : vector<1x2xf32> to vector<8x2xf32>
    %95 = arith.mulf %9, %94 : vector<8x2xf32>
    %96 = arith.addf %93, %95 : vector<8x2xf32>
    %97 = vector.broadcast %81 : vector<1x2xf32> to vector<8x2xf32>
    %98 = arith.mulf %12, %97 : vector<8x2xf32>
    %99 = arith.addf %96, %98 : vector<8x2xf32>
    %100 = math.tanh %99 : vector<8x2xf32>
    %101 = vector.extract_strided_slice %100 {offsets = [0, 0], sizes = [6, 2], strides = [1, 1]} : vector<8x2xf32> to vector<6x2xf32>
    %cst_12 = arith.constant 5.000000e-01 : f32
    %102 = vector.broadcast %cst_12 : f32 to vector<6x2xf32>
    %103 = arith.mulf %101, %102 : vector<6x2xf32>
    %cst_13 = arith.constant 5.000000e-01 : f32
    %104 = vector.broadcast %cst_13 : f32 to vector<6x2xf32>
    %105 = arith.addf %103, %104 : vector<6x2xf32>
    %106 = vector.extract_strided_slice %105 {offsets = [0, 0], sizes = [2, 2], strides = [1, 1]} : vector<6x2xf32> to vector<2x2xf32>
    %107 = vector.extract_strided_slice %105 {offsets = [2, 0], sizes = [2, 2], strides = [1, 1]} : vector<6x2xf32> to vector<2x2xf32>
    %108 = vector.extract_strided_slice %105 {offsets = [4, 0], sizes = [2, 2], strides = [1, 1]} : vector<6x2xf32> to vector<2x2xf32>
    %109 = vector.extract_strided_slice %100 {offsets = [6, 0], sizes = [2, 2], strides = [1, 1]} : vector<8x2xf32> to vector<2x2xf32>
    %110 = arith.mulf %107, %77 : vector<2x2xf32>
    %111 = arith.mulf %106, %109 : vector<2x2xf32>
    %112 = arith.addf %110, %111 : vector<2x2xf32>
    %113 = math.tanh %112 : vector<2x2xf32>
    %114 = arith.mulf %108, %113 : vector<2x2xf32>
    %115 = vector.extract_strided_slice %114 {offsets = [0, 0], sizes = [1, 2], strides = [1, 1]} : vector<2x2xf32> to vector<1x2xf32>
    %116 = vector.extract_strided_slice %114 {offsets = [1, 0], sizes = [1, 2], strides = [1, 1]} : vector<2x2xf32> to vector<1x2xf32>
    %117 = vector.broadcast %1 : vector<1x1xf32> to vector<1x2xf32>
    %118 = arith.mulf %117, %115 : vector<1x2xf32>
    %119 = vector.broadcast %2 : vector<1x1xf32> to vector<1x2xf32>
    %120 = arith.mulf %119, %116 : vector<1x2xf32>
    %121 = arith.addf %118, %120 : vector<1x2xf32>
    %122 = vector.broadcast %3 : vector<1x1xf32> to vector<1x2xf32>
    %123 = arith.addf %121, %122 : vector<1x2xf32>
    %c2 = arith.constant 2 : index
    %c0_14 = arith.constant 0 : index
    %124 = vector.load %arg3[%c2, %c0_14] : memref<8x2xf32, #tpu.memory_space<vmem>>, vector<1x2xf32>
    tpu.vector_store %arg3[%c2, %c0_14], %123 {strides = array<i32>} : memref<8x2xf32, #tpu.memory_space<vmem>>, vector<1x2xf32>,
    %125 = vector.extract_strided_slice %16 {offsets = [3, 0], sizes = [1, 2], strides = [1, 1]} : vector<8x2xf32> to vector<1x2xf32>
    %126 = vector.broadcast %125 : vector<1x2xf32> to vector<8x2xf32>
    %127 = arith.mulf %6, %126 : vector<8x2xf32>
    %128 = arith.addf %127, %15 : vector<8x2xf32>
    %129 = vector.broadcast %115 : vector<1x2xf32> to vector<8x2xf32>
    %130 = arith.mulf %9, %129 : vector<8x2xf32>
    %131 = arith.addf %128, %130 : vector<8x2xf32>
    %132 = vector.broadcast %116 : vector<1x2xf32> to vector<8x2xf32>
    %133 = arith.mulf %12, %132 : vector<8x2xf32>
    %134 = arith.addf %131, %133 : vector<8x2xf32>
    %135 = math.tanh %134 : vector<8x2xf32>
    %136 = vector.extract_strided_slice %135 {offsets = [0, 0], sizes = [6, 2], strides = [1, 1]} : vector<8x2xf32> to vector<6x2xf32>
    %cst_15 = arith.constant 5.000000e-01 : f32
    %137 = vector.broadcast %cst_15 : f32 to vector<6x2xf32>
    %138 = arith.mulf %136, %137 : vector<6x2xf32>
    %cst_16 = arith.constant 5.000000e-01 : f32
    %139 = vector.broadcast %cst_16 : f32 to vector<6x2xf32>
    %140 = arith.addf %138, %139 : vector<6x2xf32>
    %141 = vector.extract_strided_slice %140 {offsets = [0, 0], sizes = [2, 2], strides = [1, 1]} : vector<6x2xf32> to vector<2x2xf32>
    %142 = vector.extract_strided_slice %140 {offsets = [2, 0], sizes = [2, 2], strides = [1, 1]} : vector<6x2xf32> to vector<2x2xf32>
    %143 = vector.extract_strided_slice %140 {offsets = [4, 0], sizes = [2, 2], strides = [1, 1]} : vector<6x2xf32> to vector<2x2xf32>
    %144 = vector.extract_strided_slice %135 {offsets = [6, 0], sizes = [2, 2], strides = [1, 1]} : vector<8x2xf32> to vector<2x2xf32>
    %145 = arith.mulf %142, %112 : vector<2x2xf32>
    %146 = arith.mulf %141, %144 : vector<2x2xf32>
    %147 = arith.addf %145, %146 : vector<2x2xf32>
    %148 = math.tanh %147 : vector<2x2xf32>
    %149 = arith.mulf %143, %148 : vector<2x2xf32>
    %150 = vector.extract_strided_slice %149 {offsets = [0, 0], sizes = [1, 2], strides = [1, 1]} : vector<2x2xf32> to vector<1x2xf32>
    %151 = vector.extract_strided_slice %149 {offsets = [1, 0], sizes = [1, 2], strides = [1, 1]} : vector<2x2xf32> to vector<1x2xf32>
    %152 = vector.broadcast %1 : vector<1x1xf32> to vector<1x2xf32>
    %153 = arith.mulf %152, %150 : vector<1x2xf32>
    %154 = vector.broadcast %2 : vector<1x1xf32> to vector<1x2xf32>
    %155 = arith.mulf %154, %151 : vector<1x2xf32>
    %156 = arith.addf %153, %155 : vector<1x2xf32>
    %157 = vector.broadcast %3 : vector<1x1xf32> to vector<1x2xf32>
    %158 = arith.addf %156, %157 : vector<1x2xf32>
    %c3 = arith.constant 3 : index
    %c0_17 = arith.constant 0 : index
    %159 = vector.load %arg3[%c3, %c0_17] : memref<8x2xf32, #tpu.memory_space<vmem>>, vector<1x2xf32>
    tpu.vector_store %arg3[%c3, %c0_17], %158 {strides = array<i32>} : memref<8x2xf32, #tpu.memory_space<vmem>>, vector<1x2xf32>,
    %160 = vector.extract_strided_slice %16 {offsets = [4, 0], sizes = [1, 2], strides = [1, 1]} : vector<8x2xf32> to vector<1x2xf32>
    %161 = vector.broadcast %160 : vector<1x2xf32> to vector<8x2xf32>
    %162 = arith.mulf %6, %161 : vector<8x2xf32>
    %163 = arith.addf %162, %15 : vector<8x2xf32>
    %164 = vector.broadcast %150 : vector<1x2xf32> to vector<8x2xf32>
    %165 = arith.mulf %9, %164 : vector<8x2xf32>
    %166 = arith.addf %163, %165 : vector<8x2xf32>
    %167 = vector.broadcast %151 : vector<1x2xf32> to vector<8x2xf32>
    %168 = arith.mulf %12, %167 : vector<8x2xf32>
    %169 = arith.addf %166, %168 : vector<8x2xf32>
    %170 = math.tanh %169 : vector<8x2xf32>
    %171 = vector.extract_strided_slice %170 {offsets = [0, 0], sizes = [6, 2], strides = [1, 1]} : vector<8x2xf32> to vector<6x2xf32>
    %cst_18 = arith.constant 5.000000e-01 : f32
    %172 = vector.broadcast %cst_18 : f32 to vector<6x2xf32>
    %173 = arith.mulf %171, %172 : vector<6x2xf32>
    %cst_19 = arith.constant 5.000000e-01 : f32
    %174 = vector.broadcast %cst_19 : f32 to vector<6x2xf32>
    %175 = arith.addf %173, %174 : vector<6x2xf32>
    %176 = vector.extract_strided_slice %175 {offsets = [0, 0], sizes = [2, 2], strides = [1, 1]} : vector<6x2xf32> to vector<2x2xf32>
    %177 = vector.extract_strided_slice %175 {offsets = [2, 0], sizes = [2, 2], strides = [1, 1]} : vector<6x2xf32> to vector<2x2xf32>
    %178 = vector.extract_strided_slice %175 {offsets = [4, 0], sizes = [2, 2], strides = [1, 1]} : vector<6x2xf32> to vector<2x2xf32>
    %179 = vector.extract_strided_slice %170 {offsets = [6, 0], sizes = [2, 2], strides = [1, 1]} : vector<8x2xf32> to vector<2x2xf32>
    %180 = arith.mulf %177, %147 : vector<2x2xf32>
    %181 = arith.mulf %176, %179 : vector<2x2xf32>
    %182 = arith.addf %180, %181 : vector<2x2xf32>
    %183 = math.tanh %182 : vector<2x2xf32>
    %184 = arith.mulf %178, %183 : vector<2x2xf32>
    %185 = vector.extract_strided_slice %184 {offsets = [0, 0], sizes = [1, 2], strides = [1, 1]} : vector<2x2xf32> to vector<1x2xf32>
    %186 = vector.extract_strided_slice %184 {offsets = [1, 0], sizes = [1, 2], strides = [1, 1]} : vector<2x2xf32> to vector<1x2xf32>
    %187 = vector.broadcast %1 : vector<1x1xf32> to vector<1x2xf32>
    %188 = arith.mulf %187, %185 : vector<1x2xf32>
    %189 = vector.broadcast %2 : vector<1x1xf32> to vector<1x2xf32>
    %190 = arith.mulf %189, %186 : vector<1x2xf32>
    %191 = arith.addf %188, %190 : vector<1x2xf32>
    %192 = vector.broadcast %3 : vector<1x1xf32> to vector<1x2xf32>
    %193 = arith.addf %191, %192 : vector<1x2xf32>
    %c4 = arith.constant 4 : index
    %c0_20 = arith.constant 0 : index
    %194 = vector.load %arg3[%c4, %c0_20] : memref<8x2xf32, #tpu.memory_space<vmem>>, vector<1x2xf32>
    tpu.vector_store %arg3[%c4, %c0_20], %193 {strides = array<i32>} : memref<8x2xf32, #tpu.memory_space<vmem>>, vector<1x2xf32>,
    %195 = vector.extract_strided_slice %16 {offsets = [5, 0], sizes = [1, 2], strides = [1, 1]} : vector<8x2xf32> to vector<1x2xf32>
    %196 = vector.broadcast %195 : vector<1x2xf32> to vector<8x2xf32>
    %197 = arith.mulf %6, %196 : vector<8x2xf32>
    %198 = arith.addf %197, %15 : vector<8x2xf32>
    %199 = vector.broadcast %185 : vector<1x2xf32> to vector<8x2xf32>
    %200 = arith.mulf %9, %199 : vector<8x2xf32>
    %201 = arith.addf %198, %200 : vector<8x2xf32>
    %202 = vector.broadcast %186 : vector<1x2xf32> to vector<8x2xf32>
    %203 = arith.mulf %12, %202 : vector<8x2xf32>
    %204 = arith.addf %201, %203 : vector<8x2xf32>
    %205 = math.tanh %204 : vector<8x2xf32>
    %206 = vector.extract_strided_slice %205 {offsets = [0, 0], sizes = [6, 2], strides = [1, 1]} : vector<8x2xf32> to vector<6x2xf32>
    %cst_21 = arith.constant 5.000000e-01 : f32
    %207 = vector.broadcast %cst_21 : f32 to vector<6x2xf32>
    %208 = arith.mulf %206, %207 : vector<6x2xf32>
    %cst_22 = arith.constant 5.000000e-01 : f32
    %209 = vector.broadcast %cst_22 : f32 to vector<6x2xf32>
    %210 = arith.addf %208, %209 : vector<6x2xf32>
    %211 = vector.extract_strided_slice %210 {offsets = [0, 0], sizes = [2, 2], strides = [1, 1]} : vector<6x2xf32> to vector<2x2xf32>
    %212 = vector.extract_strided_slice %210 {offsets = [2, 0], sizes = [2, 2], strides = [1, 1]} : vector<6x2xf32> to vector<2x2xf32>
    %213 = vector.extract_strided_slice %210 {offsets = [4, 0], sizes = [2, 2], strides = [1, 1]} : vector<6x2xf32> to vector<2x2xf32>
    %214 = vector.extract_strided_slice %205 {offsets = [6, 0], sizes = [2, 2], strides = [1, 1]} : vector<8x2xf32> to vector<2x2xf32>
    %215 = arith.mulf %212, %182 : vector<2x2xf32>
    %216 = arith.mulf %211, %214 : vector<2x2xf32>
    %217 = arith.addf %215, %216 : vector<2x2xf32>
    %218 = math.tanh %217 : vector<2x2xf32>
    %219 = arith.mulf %213, %218 : vector<2x2xf32>
    %220 = vector.extract_strided_slice %219 {offsets = [0, 0], sizes = [1, 2], strides = [1, 1]} : vector<2x2xf32> to vector<1x2xf32>
    %221 = vector.extract_strided_slice %219 {offsets = [1, 0], sizes = [1, 2], strides = [1, 1]} : vector<2x2xf32> to vector<1x2xf32>
    %222 = vector.broadcast %1 : vector<1x1xf32> to vector<1x2xf32>
    %223 = arith.mulf %222, %220 : vector<1x2xf32>
    %224 = vector.broadcast %2 : vector<1x1xf32> to vector<1x2xf32>
    %225 = arith.mulf %224, %221 : vector<1x2xf32>
    %226 = arith.addf %223, %225 : vector<1x2xf32>
    %227 = vector.broadcast %3 : vector<1x1xf32> to vector<1x2xf32>
    %228 = arith.addf %226, %227 : vector<1x2xf32>
    %c5 = arith.constant 5 : index
    %c0_23 = arith.constant 0 : index
    %229 = vector.load %arg3[%c5, %c0_23] : memref<8x2xf32, #tpu.memory_space<vmem>>, vector<1x2xf32>
    tpu.vector_store %arg3[%c5, %c0_23], %228 {strides = array<i32>} : memref<8x2xf32, #tpu.memory_space<vmem>>, vector<1x2xf32>,
    %230 = vector.extract_strided_slice %16 {offsets = [6, 0], sizes = [1, 2], strides = [1, 1]} : vector<8x2xf32> to vector<1x2xf32>
    %231 = vector.broadcast %230 : vector<1x2xf32> to vector<8x2xf32>
    %232 = arith.mulf %6, %231 : vector<8x2xf32>
    %233 = arith.addf %232, %15 : vector<8x2xf32>
    %234 = vector.broadcast %220 : vector<1x2xf32> to vector<8x2xf32>
    %235 = arith.mulf %9, %234 : vector<8x2xf32>
    %236 = arith.addf %233, %235 : vector<8x2xf32>
    %237 = vector.broadcast %221 : vector<1x2xf32> to vector<8x2xf32>
    %238 = arith.mulf %12, %237 : vector<8x2xf32>
    %239 = arith.addf %236, %238 : vector<8x2xf32>
    %240 = math.tanh %239 : vector<8x2xf32>
    %241 = vector.extract_strided_slice %240 {offsets = [0, 0], sizes = [6, 2], strides = [1, 1]} : vector<8x2xf32> to vector<6x2xf32>
    %cst_24 = arith.constant 5.000000e-01 : f32
    %242 = vector.broadcast %cst_24 : f32 to vector<6x2xf32>
    %243 = arith.mulf %241, %242 : vector<6x2xf32>
    %cst_25 = arith.constant 5.000000e-01 : f32
    %244 = vector.broadcast %cst_25 : f32 to vector<6x2xf32>
    %245 = arith.addf %243, %244 : vector<6x2xf32>
    %246 = vector.extract_strided_slice %245 {offsets = [0, 0], sizes = [2, 2], strides = [1, 1]} : vector<6x2xf32> to vector<2x2xf32>
    %247 = vector.extract_strided_slice %245 {offsets = [2, 0], sizes = [2, 2], strides = [1, 1]} : vector<6x2xf32> to vector<2x2xf32>
    %248 = vector.extract_strided_slice %245 {offsets = [4, 0], sizes = [2, 2], strides = [1, 1]} : vector<6x2xf32> to vector<2x2xf32>
    %249 = vector.extract_strided_slice %240 {offsets = [6, 0], sizes = [2, 2], strides = [1, 1]} : vector<8x2xf32> to vector<2x2xf32>
    %250 = arith.mulf %247, %217 : vector<2x2xf32>
    %251 = arith.mulf %246, %249 : vector<2x2xf32>
    %252 = arith.addf %250, %251 : vector<2x2xf32>
    %253 = math.tanh %252 : vector<2x2xf32>
    %254 = arith.mulf %248, %253 : vector<2x2xf32>
    %255 = vector.extract_strided_slice %254 {offsets = [0, 0], sizes = [1, 2], strides = [1, 1]} : vector<2x2xf32> to vector<1x2xf32>
    %256 = vector.extract_strided_slice %254 {offsets = [1, 0], sizes = [1, 2], strides = [1, 1]} : vector<2x2xf32> to vector<1x2xf32>
    %257 = vector.broadcast %1 : vector<1x1xf32> to vector<1x2xf32>
    %258 = arith.mulf %257, %255 : vector<1x2xf32>
    %259 = vector.broadcast %2 : vector<1x1xf32> to vector<1x2xf32>
    %260 = arith.mulf %259, %256 : vector<1x2xf32>
    %261 = arith.addf %258, %260 : vector<1x2xf32>
    %262 = vector.broadcast %3 : vector<1x1xf32> to vector<1x2xf32>
    %263 = arith.addf %261, %262 : vector<1x2xf32>
    %c6 = arith.constant 6 : index
    %c0_26 = arith.constant 0 : index
    %264 = vector.load %arg3[%c6, %c0_26] : memref<8x2xf32, #tpu.memory_space<vmem>>, vector<1x2xf32>
    tpu.vector_store %arg3[%c6, %c0_26], %263 {strides = array<i32>} : memref<8x2xf32, #tpu.memory_space<vmem>>, vector<1x2xf32>,
    %265 = vector.extract_strided_slice %16 {offsets = [7, 0], sizes = [1, 2], strides = [1, 1]} : vector<8x2xf32> to vector<1x2xf32>
    %266 = vector.broadcast %265 : vector<1x2xf32> to vector<8x2xf32>
    %267 = arith.mulf %6, %266 : vector<8x2xf32>
    %268 = arith.addf %267, %15 : vector<8x2xf32>
    %269 = vector.broadcast %255 : vector<1x2xf32> to vector<8x2xf32>
    %270 = arith.mulf %9, %269 : vector<8x2xf32>
    %271 = arith.addf %268, %270 : vector<8x2xf32>
    %272 = vector.broadcast %256 : vector<1x2xf32> to vector<8x2xf32>
    %273 = arith.mulf %12, %272 : vector<8x2xf32>
    %274 = arith.addf %271, %273 : vector<8x2xf32>
    %275 = math.tanh %274 : vector<8x2xf32>
    %276 = vector.extract_strided_slice %275 {offsets = [0, 0], sizes = [6, 2], strides = [1, 1]} : vector<8x2xf32> to vector<6x2xf32>
    %cst_27 = arith.constant 5.000000e-01 : f32
    %277 = vector.broadcast %cst_27 : f32 to vector<6x2xf32>
    %278 = arith.mulf %276, %277 : vector<6x2xf32>
    %cst_28 = arith.constant 5.000000e-01 : f32
    %279 = vector.broadcast %cst_28 : f32 to vector<6x2xf32>
    %280 = arith.addf %278, %279 : vector<6x2xf32>
    %281 = vector.extract_strided_slice %280 {offsets = [0, 0], sizes = [2, 2], strides = [1, 1]} : vector<6x2xf32> to vector<2x2xf32>
    %282 = vector.extract_strided_slice %280 {offsets = [2, 0], sizes = [2, 2], strides = [1, 1]} : vector<6x2xf32> to vector<2x2xf32>
    %283 = vector.extract_strided_slice %280 {offsets = [4, 0], sizes = [2, 2], strides = [1, 1]} : vector<6x2xf32> to vector<2x2xf32>
    %284 = vector.extract_strided_slice %275 {offsets = [6, 0], sizes = [2, 2], strides = [1, 1]} : vector<8x2xf32> to vector<2x2xf32>
    %285 = arith.mulf %282, %252 : vector<2x2xf32>
    %286 = arith.mulf %281, %284 : vector<2x2xf32>
    %287 = arith.addf %285, %286 : vector<2x2xf32>
    %288 = math.tanh %287 : vector<2x2xf32>
    %289 = arith.mulf %283, %288 : vector<2x2xf32>
    %290 = vector.extract_strided_slice %289 {offsets = [0, 0], sizes = [1, 2], strides = [1, 1]} : vector<2x2xf32> to vector<1x2xf32>
    %291 = vector.extract_strided_slice %289 {offsets = [1, 0], sizes = [1, 2], strides = [1, 1]} : vector<2x2xf32> to vector<1x2xf32>
    %292 = vector.broadcast %1 : vector<1x1xf32> to vector<1x2xf32>
    %293 = arith.mulf %292, %290 : vector<1x2xf32>
    %294 = vector.broadcast %2 : vector<1x1xf32> to vector<1x2xf32>
    %295 = arith.mulf %294, %291 : vector<1x2xf32>
    %296 = arith.addf %293, %295 : vector<1x2xf32>
    %297 = vector.broadcast %3 : vector<1x1xf32> to vector<1x2xf32>
    %298 = arith.addf %296, %297 : vector<1x2xf32>
    %c7 = arith.constant 7 : index
    %c0_29 = arith.constant 0 : index
    %299 = vector.load %arg3[%c7, %c0_29] : memref<8x2xf32, #tpu.memory_space<vmem>>, vector<1x2xf32>
    tpu.vector_store %arg3[%c7, %c0_29], %298 {strides = array<i32>} : memref<8x2xf32, #tpu.memory_space<vmem>>, vector<1x2xf32>,
    return
  }
  func.func @transform_0(%arg0: i32) -> (i32, i32) {
    %c0_i32 = arith.constant 0 : i32
    %c0_i32_0 = arith.constant 0 : i32
    return %c0_i32, %arg0 : i32, i32
  }
  func.func @transform_1(%arg0: i32) -> (i32, i32) {
    %c0_i32 = arith.constant 0 : i32
    %c0_i32_0 = arith.constant 0 : i32
    %c0_i32_1 = arith.constant 0 : i32
    return %c0_i32, %c0_i32_0 : i32, i32
  }
  func.func @transform_2(%arg0: i32) -> (i32, i32) {
    %c0_i32 = arith.constant 0 : i32
    %c0_i32_0 = arith.constant 0 : i32
    return %c0_i32, %arg0 : i32, i32
  }
}

</mosaic_0001>

<bundles_post_ra>
// kernel: tpu_custom_call.1
= control target key start
LH: loop header
LB: loop body
LE: loop exit
PB: predicated region body
PF: predicated region fallthrough
CT: control target
= control target key end

     0   :  { %v436_v0 = vmov 0   ;;  %v437_v2 = vmov 3   ;;  %v30_v3 = vlaneseq  ;;  %v438_v6 = vmov 1   ;;  %s573_s1 = inlined_call_operand.vmem [shape: f32[8,8], index: 1, kind: input, shape index: {}]   ;;  %s574_s0 = inlined_call_operand.vmem [shape: f32[8,2], index: 0, kind: input, shape index: {}]   ;;  %s575_s2 = inlined_call_operand.vmem [shape: f32[8,2], index: 2, kind: output, shape index: {}]  }
   0x1   :  { %398 = vset.pattern.permute.xlu0 %v436_v0  ;;  %v11_v1 = vld [vmem:[%s573_s1] sm:$0xff]  ;;  %400 = vset.pattern.permute.xlu1 %v437_v2  ;;  %v439_v7 = vmov 2   ;;  %v440_v16 = vmov 4   ;;  %vm72_vm0 = vcmask 8192  }
   0x2   :  { %14 = vperm.xlu0 %398, %v11_v1   ;;  %26 = vperm.xlu1 %400, %v11_v1   ;;  %v31_v4 = vshrl.u32 %v30_v3, 7  ;;  %v29_v5 = vld [vmem:[%s574_s0] sm:$0xff] }
   0x4   :  { %v121_v8 = vsub.s32 2, %v31_v4  ;;  %v166_v9 = vsub.s32 3, %v31_v4  ;;  %v301_v10 = vsub.s32 6, %v31_v4  ;;  %v346_v11 = vsub.s32 7, %v31_v4 }
   0x5   :  { %v32_v17 = vsub.s32 0, %v31_v4  ;;  %v462_v18 = vsub.s32 4, %v31_v4  ;;  %v464_v19 = vsub.s32 5, %v31_v4  ;;  %v76_v53 = vsub.s32 1, %v31_v4 }
   0x6   :  { %399 = vset.pattern.permute.xlu0 %v438_v6  ;;  %401 = vset.pattern.permute.xlu1 %v439_v7  ;;  %v122_v12 = vrot.slane %v29_v5, %v121_v8  ;;  %v167_v13 = vrot.slane %v29_v5, %v166_v9  ;;  %v302_v14 = vrot.slane %v29_v5, %v301_v10 }
   0x7   :  { %18 = vperm.xlu0 %399, %v11_v1   ;;  %22 = vperm.xlu1 %401, %v11_v1   ;;  %v347_v15 = vrot.slane %v29_v5, %v346_v11  ;;  %v33_v20 = vrot.slane %v29_v5, %v32_v17  ;;  %v212_v21 = vrot.slane %v29_v5, %v462_v18 }
   0x8   :  { %v257_v22 = vrot.slane %v29_v5, %v464_v19  ;;  %v77_v54 = vrot.slane %v29_v5, %v76_v53 }
   0xb   :  { %402 = vset.pattern.permute.xlu1 %v440_v16  ;;  %403 = vset.pattern.permute.xlu0 %v440_v16 }
   0xc   :  { %58 = vperm.xlu1 %402, %v11_v1  }
  0x81   :  { %v15_v23 = vpop.permute.xlu0 %14  ;;  %v27_v24 = vpop.permute.xlu1 %26 }
  0x82   :  { %v34_v25 = vmul.f32 %v33_v20, %v15_v23  ;;  %v123_v26 = vmul.f32 %v122_v12, %v15_v23  ;;  %v168_v27 = vmul.f32 %v167_v13, %v15_v23  ;;  %v213_v28 = vmul.f32 %v212_v21, %v15_v23 }
  0x83   :  { %v258_v29 = vmul.f32 %v257_v22, %v15_v23  ;;  %v303_v30 = vmul.f32 %v302_v14, %v15_v23  ;;  %v348_v31 = vmul.f32 %v347_v15, %v15_v23  ;;  %v78_v57 = vmul.f32 %v77_v54, %v15_v23 }
  0x84   :  { %v468_v32 = vadd.f32 %v123_v26, %v27_v24  ;;  %v470_v33 = vadd.f32 %v168_v27, %v27_v24  ;;  %v472_v34 = vadd.f32 %v213_v28, %v27_v24  ;;  %v35_v40 = vadd.f32 %v34_v25, %v27_v24 }
  0x85   :  { %v474_v35 = vadd.f32 %v258_v29, %v27_v24  ;;  %v476_v36 = vadd.f32 %v303_v30, %v27_v24  ;;  %v478_v37 = vadd.f32 %v348_v31, %v27_v24  ;;  %v79_v63 = vadd.f32 %v78_v57, %v27_v24 }
  0x86   :  { %v480_v38 = vpop.permute.xlu0 %18  ;;  %v482_v39 = vpop.permute.xlu1 %22 }
  0x87   :  { %v36_v41 = vmul.f32 0.0, %v480_v38  ;;  %v38_v42 = vmul.f32 0.0, %v482_v39 }
  0x89   :  { %v37_v43 = vadd.f32 %v36_v41, %v35_v40 }
  0x8b   :  { %v39_v44 = vadd.f32 %v38_v42, %v37_v43  ;;  %v486_v59 = vpop.permute.xlu1 %58 }
  0x8c   :  { %v494_v5 = vrot.slane %v486_v59, 2 }
  0x8d   :  { %404 = vtanh.f32 %v39_v44 }
  0x97   :  { %v405_v45 = vpop.eup %404 }
  0x98   :  { %v41_v46 = vmul.f32 0.5, %v405_v45  ;;  %v45_v48 = vrot.slane %v405_v45, 6 }
  0x9a   :  { %v42_v47 = vadd.f32 0.5, %v41_v46 }
  0x9c   :  { %v47_v49 = vmul.f32 %v45_v48, %v42_v47  ;;  %v43_v50 = vmul.f32 0.0, %v42_v47 }
  0x9e   :  { %v49_v51 = vrot.slane %v47_v49, 6 }
  0xa0   :  { %v51_v52 = vadd.f32 %v49_v51, %v43_v50 }
  0xa2   :  { %406 = vtanh.f32 %v51_v52 }
  0xac   :  { %v407_v55 = vpop.eup %406 }
  0xad   :  { %v54_v56 = vrot.slane %v407_v55, 6 }
  0xaf   :  { %v56_v58 = vmul.f32 %v54_v56, %v42_v47 }
  0xb1   :  { %v83_v60 = vrot.slane %v56_v58, %v462_v18  ;;  %v89_v61 = vrot.slane %v56_v58, %v464_v19  ;;  %v62_v62 = vrot.slane %v56_v58, 4 }
  0xb3   :  { %v84_v0 = vmul.f32 %v83_v60, %v480_v38  ;;  %v64_v1 = vmul.f32 %v62_v62, %v486_v59  ;;  %v90_v3 = vmul.f32 %v89_v61, %v482_v39 }
  0xb5   :  { %v85_v2 = vadd.f32 %v84_v0, %v79_v63  ;;  %v66_v4 = vrot.slane %v64_v1, 1 }
  0xb7   :  { %v91_v6 = vadd.f32 %v90_v3, %v85_v2  ;;  %v68_v7 = vadd.f32 %v66_v4, %v64_v1 }
  0xb9   :  { %408 = vtanh.f32 %v91_v6  ;;  %v71_v8 = vadd.f32 %v494_v5, %v68_v7 }
  0xbb   :  { %73 = vst.msk [vmem:[%s575_s2] sm:$0x1] %vm72_vm0, %v71_v8 }
  0xc3   :  { %v409_v9 = vpop.eup %408 }
  0xc4   :  { %v93_v10 = vmul.f32 0.5, %v409_v9  ;;  %v97_v12 = vrot.slane %v409_v9, 6 }
  0xc6   :  { %v94_v11 = vadd.f32 0.5, %v93_v10 }
  0xc8   :  { %v99_v13 = vmul.f32 %v97_v12, %v94_v11  ;;  %v95_v14 = vmul.f32 %v94_v11, %v51_v52 }
  0xca   :  { %v101_v15 = vrot.slane %v99_v13, 6 }
  0xcc   :  { %v103_v16 = vadd.f32 %v101_v15, %v95_v14 }
  0xce   :  { %410 = vtanh.f32 %v103_v16 }
  0xd8   :  { %v411_v17 = vpop.eup %410 }
  0xd9   :  { %v106_v20 = vrot.slane %v411_v17, 6 }
  0xdb   :  { %v108_v21 = vmul.f32 %v106_v20, %v94_v11 }
  0xdd   :  { %v128_v22 = vrot.slane %v108_v21, %v462_v18  ;;  %v134_v23 = vrot.slane %v108_v21, %v464_v19  ;;  %v110_v24 = vrot.slane %v108_v21, 4 }
  0xdf   :  { %v129_v25 = vmul.f32 %v128_v22, %v480_v38  ;;  %v112_v26 = vmul.f32 %v110_v24, %v486_v59  ;;  %v135_v28 = vmul.f32 %v134_v23, %v482_v39 }
  0xe1   :  { %v130_v27 = vadd.f32 %v129_v25, %v468_v32  ;;  %v114_v29 = vrot.slane %v112_v26, 1 }
  0xe3   :  { %v136_v30 = vadd.f32 %v135_v28, %v130_v27  ;;  %v116_v31 = vadd.f32 %v114_v29, %v112_v26 }
  0xe5   :  { %412 = vtanh.f32 %v136_v30  ;;  %v117_v40 = vadd.f32 %v116_v31, %v494_v5 }
  0xe7   :  { %118 = vst.msk [vmem:[%s575_s2 + $0x1] sm:$0x1] %vm72_vm0, %v117_v40 }
  0xef   :  { %v413_v41 = vpop.eup %412 }
  0xf0   :  { %v138_v42 = vmul.f32 0.5, %v413_v41  ;;  %v142_v44 = vrot.slane %v413_v41, 6 }
  0xf2   :  { %v139_v43 = vadd.f32 0.5, %v138_v42 }
  0xf4   :  { %v144_v45 = vmul.f32 %v142_v44, %v139_v43  ;;  %v140_v46 = vmul.f32 %v139_v43, %v103_v16 }
  0xf6   :  { %v146_v32 = vrot.slane %v144_v45, 6 }
  0xf8   :  { %v148_v47 = vadd.f32 %v146_v32, %v140_v46 }
  0xfa   :  { %414 = vtanh.f32 %v148_v47 }
 0x104   :  { %v415_v48 = vpop.eup %414 }
 0x105   :  { %v151_v49 = vrot.slane %v415_v48, 6 }
 0x107   :  { %v153_v50 = vmul.f32 %v151_v49, %v139_v43 }
 0x109   :  { %v173_v51 = vrot.slane %v153_v50, %v462_v18  ;;  %v179_v52 = vrot.slane %v153_v50, %v464_v19  ;;  %v155_v53 = vrot.slane %v153_v50, 4 }
 0x10b   :  { %v174_v54 = vmul.f32 %v173_v51, %v480_v38  ;;  %v157_v55 = vmul.f32 %v155_v53, %v486_v59  ;;  %v180_v57 = vmul.f32 %v179_v52, %v482_v39 }
 0x10d   :  { %v175_v56 = vadd.f32 %v174_v54, %v470_v33  ;;  %v159_v58 = vrot.slane %v157_v55, 1 }
 0x10f   :  { %v181_v60 = vadd.f32 %v180_v57, %v175_v56  ;;  %v161_v61 = vadd.f32 %v159_v58, %v157_v55 }
 0x111   :  { %416 = vtanh.f32 %v181_v60  ;;  %v162_v62 = vadd.f32 %v161_v61, %v494_v5 }
 0x113   :  { %163 = vst.msk [vmem:[%s575_s2 + $0x2] sm:$0x1] %vm72_vm0, %v162_v62 }
 0x11b   :  { %v417_v63 = vpop.eup %416 }
 0x11c   :  { %v183_v0 = vmul.f32 0.5, %v417_v63  ;;  %v187_v2 = vrot.slane %v417_v63, 6 }
 0x11e   :  { %v184_v1 = vadd.f32 0.5, %v183_v0 }
 0x120   :  { %v185_v3 = vmul.f32 %v184_v1, %v148_v47  ;;  %v189_v4 = vmul.f32 %v187_v2, %v184_v1 }
 0x122   :  { %v191_v33 = vrot.slane %v189_v4, 6 }
 0x124   :  { %v193_v6 = vadd.f32 %v191_v33, %v185_v3 }
 0x126   :  { %418 = vtanh.f32 %v193_v6 }
 0x130   :  { %v419_v7 = vpop.eup %418 }
 0x131   :  { %v196_v8 = vrot.slane %v419_v7, 6 }
 0x133   :  { %v198_v9 = vmul.f32 %v196_v8, %v184_v1 }
 0x135   :  { %v218_v10 = vrot.slane %v198_v9, %v462_v18  ;;  %v224_v11 = vrot.slane %v198_v9, %v464_v19  ;;  %v200_v12 = vrot.slane %v198_v9, 4 }
 0x137   :  { %v219_v13 = vmul.f32 %v218_v10, %v480_v38  ;;  %v202_v14 = vmul.f32 %v200_v12, %v486_v59  ;;  %v225_v16 = vmul.f32 %v224_v11, %v482_v39 }
 0x139   :  { %v220_v15 = vadd.f32 %v219_v13, %v472_v34  ;;  %v204_v17 = vrot.slane %v202_v14, 1 }
 0x13b   :  { %v226_v20 = vadd.f32 %v225_v16, %v220_v15  ;;  %v206_v21 = vadd.f32 %v204_v17, %v202_v14 }
 0x13d   :  { %420 = vtanh.f32 %v226_v20  ;;  %v207_v22 = vadd.f32 %v206_v21, %v494_v5 }
 0x13f   :  { %208 = vst.msk [vmem:[%s575_s2 + $0x3] sm:$0x1] %vm72_vm0, %v207_v22 }
 0x147   :  { %v421_v23 = vpop.eup %420 }
 0x148   :  { %v228_v24 = vmul.f32 0.5, %v421_v23  ;;  %v232_v26 = vrot.slane %v421_v23, 6 }
 0x14a   :  { %v229_v25 = vadd.f32 0.5, %v228_v24 }
 0x14c   :  { %v230_v27 = vmul.f32 %v229_v25, %v193_v6  ;;  %v234_v28 = vmul.f32 %v232_v26, %v229_v25 }
 0x14e   :  { %v236_v34 = vrot.slane %v234_v28, 6 }
 0x150   :  { %v238_v29 = vadd.f32 %v236_v34, %v230_v27 }
 0x152   :  { %422 = vtanh.f32 %v238_v29 }
 0x15c   :  { %v423_v30 = vpop.eup %422 }
 0x15d   :  { %v241_v31 = vrot.slane %v423_v30, 6 }
 0x15f   :  { %v243_v40 = vmul.f32 %v241_v31, %v229_v25 }
 0x161   :  { %v263_v41 = vrot.slane %v243_v40, %v462_v18  ;;  %v269_v42 = vrot.slane %v243_v40, %v464_v19  ;;  %v245_v43 = vrot.slane %v243_v40, 4 }
 0x163   :  { %v264_v44 = vmul.f32 %v263_v41, %v480_v38  ;;  %v247_v45 = vmul.f32 %v245_v43, %v486_v59  ;;  %v270_v32 = vmul.f32 %v269_v42, %v482_v39 }
 0x165   :  { %v265_v46 = vadd.f32 %v264_v44, %v474_v35  ;;  %v249_v47 = vrot.slane %v247_v45, 1 }
 0x167   :  { %v271_v48 = vadd.f32 %v270_v32, %v265_v46  ;;  %v251_v49 = vadd.f32 %v249_v47, %v247_v45 }
 0x169   :  { %424 = vtanh.f32 %v271_v48  ;;  %v252_v50 = vadd.f32 %v251_v49, %v494_v5 }
 0x16b   :  { %253 = vst.msk [vmem:[%s575_s2 + $0x4] sm:$0x1] %vm72_vm0, %v252_v50 }
 0x173   :  { %v425_v51 = vpop.eup %424 }
 0x174   :  { %v273_v52 = vmul.f32 0.5, %v425_v51  ;;  %v277_v54 = vrot.slane %v425_v51, 6 }
 0x176   :  { %v274_v53 = vadd.f32 0.5, %v273_v52 }
 0x178   :  { %v275_v55 = vmul.f32 %v274_v53, %v238_v29  ;;  %v279_v56 = vmul.f32 %v277_v54, %v274_v53 }
 0x17a   :  { %v281_v35 = vrot.slane %v279_v56, 6 }
 0x17c   :  { %v283_v57 = vadd.f32 %v281_v35, %v275_v55 }
 0x17e   :  { %426 = vtanh.f32 %v283_v57 }
 0x188   :  { %v427_v58 = vpop.eup %426 }
 0x189   :  { %v286_v60 = vrot.slane %v427_v58, 6 }
 0x18b   :  { %v288_v61 = vmul.f32 %v286_v60, %v274_v53 }
 0x18d   :  { %v308_v62 = vrot.slane %v288_v61, %v462_v18  ;;  %v314_v63 = vrot.slane %v288_v61, %v464_v19  ;;  %v290_v0 = vrot.slane %v288_v61, 4 }
 0x18f   :  { %v309_v1 = vmul.f32 %v308_v62, %v480_v38  ;;  %v292_v2 = vmul.f32 %v290_v0, %v486_v59  ;;  %v315_v4 = vmul.f32 %v314_v63, %v482_v39 }
 0x191   :  { %v310_v3 = vadd.f32 %v309_v1, %v476_v36  ;;  %v294_v33 = vrot.slane %v292_v2, 1 }
 0x193   :  { %v316_v6 = vadd.f32 %v315_v4, %v310_v3  ;;  %v296_v7 = vadd.f32 %v294_v33, %v292_v2 }
 0x195   :  { %428 = vtanh.f32 %v316_v6  ;;  %v297_v8 = vadd.f32 %v296_v7, %v494_v5 }
 0x197   :  { %298 = vst.msk [vmem:[%s575_s2 + $0x5] sm:$0x1] %vm72_vm0, %v297_v8 }
 0x19f   :  { %v429_v9 = vpop.eup %428 }
 0x1a0   :  { %v318_v10 = vmul.f32 0.5, %v429_v9  ;;  %v322_v12 = vrot.slane %v429_v9, 6 }
 0x1a2   :  { %v319_v11 = vadd.f32 0.5, %v318_v10 }
 0x1a4   :  { %v320_v13 = vmul.f32 %v319_v11, %v283_v57  ;;  %v324_v14 = vmul.f32 %v322_v12, %v319_v11 }
 0x1a6   :  { %v326_v36 = vrot.slane %v324_v14, 6 }
 0x1a8   :  { %v328_v15 = vadd.f32 %v326_v36, %v320_v13 }
 0x1aa   :  { %430 = vtanh.f32 %v328_v15 }
 0x1b4   :  { %v431_v16 = vpop.eup %430 }
 0x1b5   :  { %v331_v17 = vrot.slane %v431_v16, 6 }
 0x1b7   :  { %v333_v20 = vmul.f32 %v331_v17, %v319_v11 }
 0x1b9   :  { %v353_v21 = vrot.slane %v333_v20, %v462_v18  ;;  %v359_v22 = vrot.slane %v333_v20, %v464_v19  ;;  %v335_v23 = vrot.slane %v333_v20, 4 }
 0x1bb   :  { %v354_v24 = vmul.f32 %v353_v21, %v480_v38  ;;  %v337_v25 = vmul.f32 %v335_v23, %v486_v59  ;;  %v360_v27 = vmul.f32 %v359_v22, %v482_v39 }
 0x1bd   :  { %v355_v26 = vadd.f32 %v354_v24, %v478_v37  ;;  %v339_v28 = vrot.slane %v337_v25, 1 }
 0x1bf   :  { %v361_v34 = vadd.f32 %v360_v27, %v355_v26  ;;  %v341_v29 = vadd.f32 %v339_v28, %v337_v25 }
 0x1c1   :  { %432 = vtanh.f32 %v361_v34  ;;  %v342_v30 = vadd.f32 %v341_v29, %v494_v5 }
 0x1c3   :  { %343 = vst.msk [vmem:[%s575_s2 + $0x6] sm:$0x1] %vm72_vm0, %v342_v30 }
 0x1cb   :  { %v433_v18 = vpop.eup %432 }
 0x1cc   :  { %v363_v19 = vmul.f32 0.5, %v433_v18  ;;  %v367_v31 = vrot.slane %v433_v18, 6 }
 0x1ce   :  { %v364_v38 = vadd.f32 0.5, %v363_v19 }
 0x1d0   :  { %v365_v40 = vmul.f32 %v364_v38, %v328_v15  ;;  %v369_v41 = vmul.f32 %v367_v31, %v364_v38 }
 0x1d2   :  { %v371_v37 = vrot.slane %v369_v41, 6 }
 0x1d4   :  { %v373_v42 = vadd.f32 %v371_v37, %v365_v40 }
 0x1d6   :  { %434 = vtanh.f32 %v373_v42 }
 0x1e0   :  { %v435_v39 = vpop.eup %434 }
 0x1e1   :  { %v376_v43 = vrot.slane %v435_v39, 6 }
 0x1e3   :  { %v378_v44 = vmul.f32 %v376_v43, %v364_v38 }
 0x1e5   :  { %v380_v45 = vrot.slane %v378_v44, 4 }
 0x1e7   :  { %v382_v46 = vmul.f32 %v380_v45, %v486_v59 }
 0x1e9   :  { %v384_v32 = vrot.slane %v382_v46, 1 }
 0x1eb   :  { %v386_v47 = vadd.f32 %v384_v32, %v382_v46 }
 0x1ed   :  { %v387_v48 = vadd.f32 %v386_v47, %v494_v5 }
 0x1ef   :  { %388 = vst.msk [vmem:[%s575_s2 + $0x7] sm:$0x1] %vm72_vm0, %v387_v48 }

</bundles_post_ra>
